<compile_context>
chip_gen: v7x
topology: tpu7x:2x2x1
jax: 0.10.0
libtpu: 0.0.40
codegen_flags: <defaults>
</compile_context>

<pallas_src>
import math

import jax
import jax.numpy as jnp
from jax.experimental import pallas as pl
from jax.experimental.pallas import tpu as pltpu

GN_EPS = 1e-5  # PyTorch GroupNorm default eps


def _shuffle_attention_kernel(x_ref, p_ref, o_ref):
    """One grid step: TB batch elements x TR channel rows x both channel halves.

    x_ref: (TB, 2, TR, S)   input tile (native dtype)
    p_ref: (2, TR, 3)       per-row gate constants [p_a, p_b, p_c] (f32)
    o_ref: (TB, TR, 2*S)    output tile; half h goes to lanes [h*S:(h+1)*S]
                            (trailing reshape of the full output realizes
                             channel_shuffle(groups=2) for free)
    """
    S = x_ref.shape[-1]
    inv_s = jnp.float32(1.0 / S)

    for h in (0, 1):  # static unroll over the two channel halves
        x = x_ref[:, h, :, :]                             # (TB, TR, S), native dtype
        xf = x.astype(jnp.float32)

        p = p_ref[h].astype(jnp.float32)                  # (TR, 3)
        p_a = p[:, 0:1]                                   # (TR, 1)
        p_b = p[:, 1:2]
        p_c = p[:, 2:3]

        # Per-row stats, always accumulated in f32.  Two-pass variance: x is
        # resident in VMEM, so the centered sweep is cheap and avoids the
        # catastrophic cancellation of E[x^2] - mean^2.
        mean = jnp.sum(xf, axis=-1, keepdims=True) * inv_s            # (TB, TR, 1)
        centered = xf - mean
        var = jnp.sum(centered * centered, axis=-1, keepdims=True) * inv_s
        rstd = jax.lax.rsqrt(var + GN_EPS)

        a = p_a * rstd                      # 0 for channel-branch rows
        b = p_c + p_b * mean - a * mean     # cw*mean+cb (channel) / GN-gate (spatial)

        # Gate math in the input dtype: bf16 inputs keep VALU/EUP work packed
        # (2/lane) on v6e/v7x; f32 inputs stay f32 (what v5e requires anyway).
        a_g = a.astype(x.dtype)
        b_g = b.astype(x.dtype)
        y = x * jax.nn.sigmoid(a_g * x + b_g)

        o_ref[:, :, h * S:(h + 1) * S] = y.astype(o_ref.dtype)


def _row_param_table(cweight, cbias, sweight, sbias, gn_w, gn_b, C, G):
    """Per-channel gate constants, laid out as (2, C//2, 3) = (half, row, [a, b, c])."""
    C2 = C // (2 * G)
    c_old = jnp.arange(C)                 # channel index inside a batch element
    c_loc = c_old % (2 * C2)              # channel inside the (b, g) chunk
    idx = c_loc % C2                      # parameter index
    is_sp = c_loc >= C2                   # spatial (GroupNorm) branch rows

    cw = cweight.reshape(-1)[idx].astype(jnp.float32)
    cb = cbias.reshape(-1)[idx].astype(jnp.float32)
    sw = sweight.reshape(-1)[idx].astype(jnp.float32)
    sb = sbias.reshape(-1)[idx].astype(jnp.float32)
    gw = gn_w.reshape(-1)[idx].astype(jnp.float32)
    gb = gn_b.reshape(-1)[idx].astype(jnp.float32)

    p_a = jnp.where(is_sp, sw * gw, 0.0)
    p_b = jnp.where(is_sp, 0.0, cw)
    p_c = jnp.where(is_sp, sw * gb + sb, cb)
    return jnp.stack([p_a, p_b, p_c], axis=-1).reshape(2, C // 2, 3)


def _vmem_capacity_bytes():
    try:
        return int(pltpu.get_tpu_info().vmem_capacity_bytes)
    except Exception:
        return 64 * 1024 * 1024   # conservative: v7x per-TensorCore VMEM


def _pick_tiles(B, R, S, itemsize, budget):
    """Largest (TB, TR) whose per-step VMEM footprint fits `budget`."""

    def step_bytes(tb, tr):
        in_blk = tb * 2 * tr * S * itemsize      # input block  (double-buffered)
        out_blk = tb * tr * 2 * S * itemsize     # output block (double-buffered)
        f32_tmp = 2 * tb * 2 * tr * S * 4        # in-kernel f32 temporaries
        return 2 * in_blk + 2 * out_blk + f32_tmp

    # Row tile: divisors of R that are sublane-aligned (multiple of 8), or R itself.
    tr_opts = [d for d in range(R, 0, -1) if R % d == 0 and (d % 8 == 0 or d == R)]
    TR = None
    for d in tr_opts:
        if step_bytes(1, d) <= budget:
            TR = d
            break
    if TR is None:
        TR = tr_opts[-1]   # best effort; see TODO(synk) about S-axis tiling

    per_b = max(step_bytes(1, TR), 1)
    TB = max(1, min(B, budget // per_b))
    return TB, TR


def shuffle_attention(x, cweight, cbias, sweight, sbias, gn_weight, gn_bias,
                      G=8, block_budget_bytes=None):
    """ShuffleAttention forward.  x: (B, C, *spatial) — 2D (H, W) or 3D (H, W, D)."""
    B, C = x.shape[0], x.shape[1]
    spatial = x.shape[2:]
    assert C % (2 * G) == 0, "channel must be divisible by 2*G"
    S = int(math.prod(spatial))
    R = C // 2

    params = _row_param_table(cweight, cbias, sweight, sbias, gn_weight, gn_bias, C, G)
    x4 = x.reshape(B, 2, R, S)   # free view of the contiguous NC(spatial) layout

    # Chip-aware VMEM budgeting (no hardcoded 2 MiB blocks / 32 MiB limit).
    cap = _vmem_capacity_bytes()
    vmem_limit = min(cap * 3 // 4, 96 * 1024 * 1024)   # ~96 MiB v5e/v6e, ~48 MiB v7x
    budget = block_budget_bytes if block_budget_bytes is not None else (vmem_limit * 3) // 5
    TB, TR = _pick_tiles(B, R, S, x.dtype.itemsize, budget)

    # Keep >= 2 grid steps when possible so both v7x TensorCores get work.
    n_r = R // TR
    n_b = -(-B // TB)
    if n_r * n_b < 2 and B >= 2:
        TB = (B + 1) // 2
        n_b = -(-B // TB)

    grid = (n_r, n_b)   # r slow (params re-DMAed only n_r times), batch fast

    out = pl.pallas_call(
        _shuffle_attention_kernel,
        out_shape=jax.ShapeDtypeStruct((B, R, 2 * S), x.dtype),
        grid_spec=pltpu.PrefetchScalarGridSpec(
            num_scalar_prefetch=0,
            grid=grid,
            in_specs=[
                pl.BlockSpec((TB, 2, TR, S), lambda r, b: (b, 0, r, 0)),
                pl.BlockSpec((2, TR, 3), lambda r, b: (0, r, 0)),
            ],
            out_specs=pl.BlockSpec((TB, TR, 2 * S), lambda r, b: (b, r, 0)),
        ),
        compiler_params=pltpu.CompilerParams(
            dimension_semantics=("parallel", "parallel"),
            vmem_limit_bytes=int(vmem_limit),
        ),
    )(x4, params)

    # Contiguous reshape (B, R, 2, S) -> (B, C, *spatial) == channel_shuffle(groups=2).
    return out.reshape((B, C) + spatial)


def _reference(x, cweight, cbias, sweight, sbias, gn_weight, gn_bias, G=8):
    """Pure-JAX mirror of the PyTorch forward (2D and 3D branches)."""
    B, C = x.shape[0], x.shape[1]
    spatial = x.shape[2:]
    S = int(math.prod(spatial))
    C2 = C // (2 * G)
    xg = x.reshape(B * G, 2 * C2, S)
    x0, x1 = xg[:, :C2], xg[:, C2:]
    cw = cweight.reshape(1, C2, 1)
    cb = cbias.reshape(1, C2, 1)
    sw = sweight.reshape(1, C2, 1)
    sb = sbias.reshape(1, C2, 1)
    gw = gn_weight.reshape(1, C2, 1)
    gb = gn_bias.reshape(1, C2, 1)

    pooled = jnp.mean(x0, axis=-1, keepdims=True)
    x_channel = x0 * jax.nn.sigmoid(cw * pooled + cb)

    mu = jnp.mean(x1, axis=-1, keepdims=True)
    var = jnp.mean((x1 - mu) ** 2, axis=-1, keepdims=True)
    xn = (x1 - mu) / jnp.sqrt(var + GN_EPS) * gw + gb
    x_spatial = x1 * jax.nn.sigmoid(sw * xn + sb)

    out = jnp.concatenate([x_channel, x_spatial], axis=1).reshape(B, C, S)
    out = out.reshape(B, 2, C // 2, S)
    out = jnp.transpose(out, (0, 2, 1, 3)).reshape((B, C) + spatial)
    return out


def _check(shape, G, key, default_init, block_budget_bytes=None):
    B, C = shape[0], shape[1]
    C2 = C // (2 * G)
    kx, kp = jax.random.split(key)
    x = jax.random.normal(kx, shape, dtype=jnp.float32)
    if default_init:
        # PyTorch __init__ defaults: cweight=0, cbias=1, sweight=0, sbias=1, GN w=1 b=0.
        cweight = jnp.zeros((C2,), jnp.float32)
        cbias = jnp.ones((C2,), jnp.float32)
        sweight = jnp.zeros((C2,), jnp.float32)
        sbias = jnp.ones((C2,), jnp.float32)
        gn_w = jnp.ones((C2,), jnp.float32)
        gn_b = jnp.zeros((C2,), jnp.float32)
    else:
        ks = jax.random.split(kp, 6)
        cweight, cbias, sweight, sbias, gn_w, gn_b = [
            jax.random.normal(k, (C2,), jnp.float32) for k in ks]

    out = jax.block_until_ready(shuffle_attention(
        x, cweight, cbias, sweight, sbias, gn_w, gn_b, G=G,
        block_budget_bytes=block_budget_bytes))
    ref = jax.block_until_ready(_reference(
        x, cweight, cbias, sweight, sbias, gn_w, gn_b, G=G))
    assert out.shape == x.shape
    err = float(jnp.max(jnp.abs(out - ref)))
    assert err < 1e-4, f"shape={shape} max abs err {err}"


if __name__ == "__main__":
    key = jax.random.PRNGKey(0)
    k1, k2, k3, k4, k5 = jax.random.split(key, 5)
    # 2D, lane-aligned spatial (HW % 128 == 0), random params so both gate paths matter.
    _check((2, 32, 16, 16), G=8, key=k1, default_init=False)
    # 2D, PyTorch default parameter init.
    _check((2, 32, 16, 16), G=8, key=k2, default_init=True)
    # 2D, HW % 128 != 0: the fused-shuffle output layout is still used (no wrapper shuffle).
    _check((2, 32, 8, 8), G=8, key=k3, default_init=False)
    # Forced tiny block budget: exercises the row-tiled (TR=8) path and a 2x2 grid.
    _check((2, 32, 16, 16), G=8, key=k4, default_init=False, block_budget_bytes=1)
    # 3D (Conv3d) branch + odd batch (ragged batch tail via ceil-div grid).
    _check((3, 32, 8, 8, 4), G=8, key=k5, default_init=False)
    print("KERNEL_OK")
</pallas_src>

<mosaic_0001>
module attributes {stable_mosaic.version = 11 : i64} {
  func.func @_shuffle_attention_kernel(%arg0: i32, %arg1: i32, %arg2: memref<1x2x16x256xf32, #tpu.memory_space<vmem>>, %arg3: memref<2x16x3xf32, #tpu.memory_space<vmem>>, %arg4: memref<1x16x512xf32, #tpu.memory_space<vmem>>) attributes {dimension_semantics = [#tpu.dimension_semantics<parallel>, #tpu.dimension_semantics<parallel>], iteration_bounds = array<i64: 1, 2>, scalar_prefetch = 0 : i64, scratch_operands = 0 : i64, tpu.core_type = #tpu.core_type<tc>, window_params = [{transform_indices = @transform_0, window_bounds = array<i64: 1, 2, 16, 256>}, {transform_indices = @transform_1, window_bounds = array<i64: 2, 16, 3>}, {transform_indices = @transform_2, window_bounds = array<i64: 1, 16, 512>}]} {
    %c0 = arith.constant 0 : index
    %c0_0 = arith.constant 0 : index
    %c0_1 = arith.constant 0 : index
    %c0_2 = arith.constant 0 : index
    %0 = vector.load %arg2[%c0, %c0_0, %c0_1, %c0_2] : memref<1x2x16x256xf32, #tpu.memory_space<vmem>>, vector<1x1x16x256xf32>
    %1 = vector.shape_cast %0 : vector<1x1x16x256xf32> to vector<1x16x256xf32>
    %c0_3 = arith.constant 0 : index
    %c0_4 = arith.constant 0 : index
    %c0_5 = arith.constant 0 : index
    %2 = vector.load %arg3[%c0_3, %c0_4, %c0_5] : memref<2x16x3xf32, #tpu.memory_space<vmem>>, vector<1x16x3xf32>
    %3 = vector.shape_cast %2 : vector<1x16x3xf32> to vector<16x3xf32>
    %4 = vector.extract_strided_slice %3 {offsets = [0, 0], sizes = [16, 1], strides = [1, 1]} : vector<16x3xf32> to vector<16x1xf32>
    %5 = vector.extract_strided_slice %3 {offsets = [0, 1], sizes = [16, 1], strides = [1, 1]} : vector<16x3xf32> to vector<16x1xf32>
    %6 = vector.extract_strided_slice %3 {offsets = [0, 2], sizes = [16, 1], strides = [1, 1]} : vector<16x3xf32> to vector<16x1xf32>
    %cst = arith.constant dense<0.000000e+00> : vector<1x16xf32>
    %7 = vector.multi_reduction <add>, %1, %cst [2] : vector<1x16x256xf32> to vector<1x16xf32>
    %8 = vector.shape_cast %7 : vector<1x16xf32> to vector<1x16x1xf32>
    %cst_6 = arith.constant 3.906250e-03 : f32
    %9 = vector.broadcast %cst_6 : f32 to vector<1x16x1xf32>
    %10 = arith.mulf %8, %9 : vector<1x16x1xf32>
    %11 = vector.broadcast %10 : vector<1x16x1xf32> to vector<1x16x256xf32>
    %12 = arith.subf %1, %11 : vector<1x16x256xf32>
    %13 = arith.mulf %12, %12 : vector<1x16x256xf32>
    %cst_7 = arith.constant dense<0.000000e+00> : vector<1x16xf32>
    %14 = vector.multi_reduction <add>, %13, %cst_7 [2] : vector<1x16x256xf32> to vector<1x16xf32>
    %15 = vector.shape_cast %14 : vector<1x16xf32> to vector<1x16x1xf32>
    %cst_8 = arith.constant 3.906250e-03 : f32
    %16 = vector.broadcast %cst_8 : f32 to vector<1x16x1xf32>
    %17 = arith.mulf %15, %16 : vector<1x16x1xf32>
    %cst_9 = arith.constant 9.99999974E-6 : f32
    %18 = vector.broadcast %cst_9 : f32 to vector<1x16x1xf32>
    %19 = arith.addf %17, %18 : vector<1x16x1xf32>
    %20 = math.rsqrt %19 : vector<1x16x1xf32>
    %21 = vector.shape_cast %4 : vector<16x1xf32> to vector<1x16x1xf32>
    %22 = arith.mulf %21, %20 : vector<1x16x1xf32>
    %23 = vector.shape_cast %5 : vector<16x1xf32> to vector<1x16x1xf32>
    %24 = arith.mulf %23, %10 : vector<1x16x1xf32>
    %25 = vector.shape_cast %6 : vector<16x1xf32> to vector<1x16x1xf32>
    %26 = arith.addf %25, %24 : vector<1x16x1xf32>
    %27 = arith.mulf %22, %10 : vector<1x16x1xf32>
    %28 = arith.subf %26, %27 : vector<1x16x1xf32>
    %29 = vector.broadcast %22 : vector<1x16x1xf32> to vector<1x16x256xf32>
    %30 = arith.mulf %29, %1 : vector<1x16x256xf32>
    %31 = vector.broadcast %28 : vector<1x16x1xf32> to vector<1x16x256xf32>
    %32 = arith.addf %30, %31 : vector<1x16x256xf32>
    %33 = arith.negf %32 : vector<1x16x256xf32>
    %34 = math.exp %33 : vector<1x16x256xf32>
    %cst_10 = arith.constant 1.000000e+00 : f32
    %35 = vector.broadcast %cst_10 : f32 to vector<1x16x256xf32>
    %36 = arith.addf %35, %34 : vector<1x16x256xf32>
    %37 = arith.divf %35, %36 : vector<1x16x256xf32>
    %38 = arith.mulf %1, %37 : vector<1x16x256xf32>
    %c0_11 = arith.constant 0 : index
    %c0_12 = arith.constant 0 : index
    %c0_13 = arith.constant 0 : index
    %39 = vector.load %arg4[%c0_11, %c0_12, %c0_13] : memref<1x16x512xf32, #tpu.memory_space<vmem>>, vector<1x16x256xf32>
    tpu.vector_store %arg4[%c0_11, %c0_12, %c0_13], %38 {strides = array<i32>} : memref<1x16x512xf32, #tpu.memory_space<vmem>>, vector<1x16x256xf32>,
    %c0_14 = arith.constant 0 : index
    %c1 = arith.constant 1 : index
    %c0_15 = arith.constant 0 : index
    %c0_16 = arith.constant 0 : index
    %40 = vector.load %arg2[%c0_14, %c1, %c0_15, %c0_16] : memref<1x2x16x256xf32, #tpu.memory_space<vmem>>, vector<1x1x16x256xf32>
    %41 = vector.shape_cast %40 : vector<1x1x16x256xf32> to vector<1x16x256xf32>
    %c1_17 = arith.constant 1 : index
    %c0_18 = arith.constant 0 : index
    %c0_19 = arith.constant 0 : index
    %42 = vector.load %arg3[%c1_17, %c0_18, %c0_19] : memref<2x16x3xf32, #tpu.memory_space<vmem>>, vector<1x16x3xf32>
    %43 = vector.shape_cast %42 : vector<1x16x3xf32> to vector<16x3xf32>
    %44 = vector.extract_strided_slice %43 {offsets = [0, 0], sizes = [16, 1], strides = [1, 1]} : vector<16x3xf32> to vector<16x1xf32>
    %45 = vector.extract_strided_slice %43 {offsets = [0, 1], sizes = [16, 1], strides = [1, 1]} : vector<16x3xf32> to vector<16x1xf32>
    %46 = vector.extract_strided_slice %43 {offsets = [0, 2], sizes = [16, 1], strides = [1, 1]} : vector<16x3xf32> to vector<16x1xf32>
    %cst_20 = arith.constant dense<0.000000e+00> : vector<1x16xf32>
    %47 = vector.multi_reduction <add>, %41, %cst_20 [2] : vector<1x16x256xf32> to vector<1x16xf32>
    %48 = vector.shape_cast %47 : vector<1x16xf32> to vector<1x16x1xf32>
    %cst_21 = arith.constant 3.906250e-03 : f32
    %49 = vector.broadcast %cst_21 : f32 to vector<1x16x1xf32>
    %50 = arith.mulf %48, %49 : vector<1x16x1xf32>
    %51 = vector.broadcast %50 : vector<1x16x1xf32> to vector<1x16x256xf32>
    %52 = arith.subf %41, %51 : vector<1x16x256xf32>
    %53 = arith.mulf %52, %52 : vector<1x16x256xf32>
    %cst_22 = arith.constant dense<0.000000e+00> : vector<1x16xf32>
    %54 = vector.multi_reduction <add>, %53, %cst_22 [2] : vector<1x16x256xf32> to vector<1x16xf32>
    %55 = vector.shape_cast %54 : vector<1x16xf32> to vector<1x16x1xf32>
    %cst_23 = arith.constant 3.906250e-03 : f32
    %56 = vector.broadcast %cst_23 : f32 to vector<1x16x1xf32>
    %57 = arith.mulf %55, %56 : vector<1x16x1xf32>
    %cst_24 = arith.constant 9.99999974E-6 : f32
    %58 = vector.broadcast %cst_24 : f32 to vector<1x16x1xf32>
    %59 = arith.addf %57, %58 : vector<1x16x1xf32>
    %60 = math.rsqrt %59 : vector<1x16x1xf32>
    %61 = vector.shape_cast %44 : vector<16x1xf32> to vector<1x16x1xf32>
    %62 = arith.mulf %61, %60 : vector<1x16x1xf32>
    %63 = vector.shape_cast %45 : vector<16x1xf32> to vector<1x16x1xf32>
    %64 = arith.mulf %63, %50 : vector<1x16x1xf32>
    %65 = vector.shape_cast %46 : vector<16x1xf32> to vector<1x16x1xf32>
    %66 = arith.addf %65, %64 : vector<1x16x1xf32>
    %67 = arith.mulf %62, %50 : vector<1x16x1xf32>
    %68 = arith.subf %66, %67 : vector<1x16x1xf32>
    %69 = vector.broadcast %62 : vector<1x16x1xf32> to vector<1x16x256xf32>
    %70 = arith.mulf %69, %41 : vector<1x16x256xf32>
    %71 = vector.broadcast %68 : vector<1x16x1xf32> to vector<1x16x256xf32>
    %72 = arith.addf %70, %71 : vector<1x16x256xf32>
    %73 = arith.negf %72 : vector<1x16x256xf32>
    %74 = math.exp %73 : vector<1x16x256xf32>
    %cst_25 = arith.constant 1.000000e+00 : f32
    %75 = vector.broadcast %cst_25 : f32 to vector<1x16x256xf32>
    %76 = arith.addf %75, %74 : vector<1x16x256xf32>
    %77 = arith.divf %75, %76 : vector<1x16x256xf32>
    %78 = arith.mulf %41, %77 : vector<1x16x256xf32>
    %c0_26 = arith.constant 0 : index
    %c0_27 = arith.constant 0 : index
    %c256 = arith.constant 256 : index
    %79 = vector.load %arg4[%c0_26, %c0_27, %c256] : memref<1x16x512xf32, #tpu.memory_space<vmem>>, vector<1x16x256xf32>
    tpu.vector_store %arg4[%c0_26, %c0_27, %c256], %78 {strides = array<i32>} : memref<1x16x512xf32, #tpu.memory_space<vmem>>, vector<1x16x256xf32>,
    return
  }
  func.func @transform_0(%arg0: i32, %arg1: i32) -> (i32, i32, i32, i32) {
    %c0_i32 = arith.constant 0 : i32
    %c0_i32_0 = arith.constant 0 : i32
    %c0_i32_1 = arith.constant 0 : i32
    return %arg1, %c0_i32, %arg0, %c0_i32_0 : i32, i32, i32, i32
  }
  func.func @transform_1(%arg0: i32, %arg1: i32) -> (i32, i32, i32) {
    %c0_i32 = arith.constant 0 : i32
    %c0_i32_0 = arith.constant 0 : i32
    %c0_i32_1 = arith.constant 0 : i32
    return %c0_i32, %arg0, %c0_i32_0 : i32, i32, i32
  }
  func.func @transform_2(%arg0: i32, %arg1: i32) -> (i32, i32, i32) {
    %c0_i32 = arith.constant 0 : i32
    %c0_i32_0 = arith.constant 0 : i32
    return %arg1, %arg0, %c0_i32 : i32, i32, i32
  }
}

</mosaic_0001>

<bundles_post_ra>
// kernel: tpu_custom_call.1
= control target key start
LH: loop header
LB: loop body
LE: loop exit
PB: predicated region body
PF: predicated region fallthrough
CT: control target
= control target key end

     0   :  { %7 = vsyncpa [#allocation3], 0  ;;  %s1119_s0 = inlined_call_operand.hbm [shape: f32[2,2,16,256], index: 0, kind: input, shape index: {}]   ;;  %s1120_s1 = inlined_call_operand.vmem [shape: f32[2,16,3], index: 1, kind: input, shape index: {}]   ;;  %s1121_s2 = inlined_call_operand.hbm [shape: f32[2,16,512], index: 2, kind: output, shape index: {}]  }
   0x1   :  { %9 = vsyncpa [#allocation3 + $0x1], 0 }
   0x2   :  { %10 = vsyncpa [#allocation4], 0 }
   0x3   :  { %12 = vsyncpa [#allocation4 + $0x1], 0  ;;  %s851_s9 = smov 0   ;;  %s853_s10 = smov 0  }
   0x4   :  { %s855_s11 = smov 0   ;;  %s857_s12 = smov 0  }
   0x5   :  { %s859_s13 = smov 0   ;;  %s861_s14 = smov 0  }
   0x6 LB: > { %s566_s15 = sadd.s32 4294967295, %s824_s14   ;;  %s567_s16 = sadd.s32 4294967294, %s824_s14   ;;  %s824_s14 = sphi %s861_s14, %s18_s14   ;;  %s820_s13 = sphi %s859_s13, %s1136_s13   ;;  %s816_s12 = sphi %s857_s12, %s1135_s12   ;;  %s812_s11 = sphi %s855_s11, %s1134_s11   ;;  %s808_s10 = sphi %s853_s10, %s1133_s10   ;;  %s804_s9 = sphi %s851_s9, %s1132_s9  }
   0x7   : > { %s27_s17 = sadd.s32 1, %s820_s13  ;;  %s39_s18 = sadd.s32 1, %s812_s11 }
   0x8   : > { %p28_p0 = scmp.ge.s32.totalorder %s27_s17, 2  ;;  %p46_p1 = scmp.ne.s32.totalorder %s812_s11, %s808_s10 }
   0x9   : > { %p47_p2 = scmp.eq.s32.totalorder %s824_s14, 0  ;;  %p52_p3 = scmp.ne.s32.totalorder %s808_s10, %s804_s9 }
   0xa   : > { %s1138_s17 = smov (%p28_p0, %s27_s17), 0  ;;  %p53_p5 = scmp.eq.s32.totalorder %s566_s15, 0 }
   0xb   : > { %p892_p4 = por %p47_p2, %p46_p1  ;;  %s34_s20 = ssub.s32 %s820_s13, %s1138_s17 }
   0xc   : > { %p104_p6 = scmp.eq.s32.totalorder %s566_s15, 1  ;;  %p37_p7 = scmp.eq.s32.totalorder %s34_s20, 0 }
   0xd   : > { %p898_p8 = por %p53_p5, %p52_p3  ;;  %p110_p10 = scmp.eq.s32.totalorder %s567_s16, 1 }
   0xe   : > { %p902_p9 = por %p104_p6, %p46_p1  ;;  %p610_p13 = scmp.lt.s32.totalorder %s824_s14, 2 }
   0xf   : > { %s907_s23 = scalar_select %p37_p7, %s812_s11, %s39_s18  }
  0x10   : > { %s1125_s22 = scalar_select %p902_p9, 1, 0 }
  0x11   : > { %p909_p11 = por %p110_p10, %p52_p3  ;;  %s139_s25 = sand.u32 1, %s812_s11  }
  0x12   : > { %s571_s26 = sshll.u32 %s139_s25, 6  ;;  %s596_s27 = sshll.u32 %s820_s13, 10 }
  0x13   : > { %s1126_s24 = scalar_select %p909_p11, 1, 0 }
  0x14   : > { %s920_s30 = scalar_lea.hbm %s1119_s0, %s596_s27  ;;  %s143_s3 = scalar_lea.vmem [#allocation2], %s571_s26 }
  0x15   : > { %s153_s4 = sshll.u32 %s143_s3, 4  ;;  %p926_p0 = pnand %p610_p13, %p892_p4  ;;  %s922_s4 = int_to_ptr.vmem [resolvable:$true] %s153_s4 }
  0x16   : > { %s931_s6 = scalar_lea.sflag [#allocation3], %s139_s25  ;;  %s712_s7 = scalar_lea.hbm %s920_s30, 1024 }
  0x17   : > { %p713_p2 = scmp.ne.s32.totalorder %s920_s30, %s712_s7  ;;  %p714_p3 = pneg %p926_p0 }
  0x18   : > { %s717_s16 = scalar_lea.hbm %s1119_s0, 2048  ;;  %p718_p4 = scmp.lt.u32.totalorder %s920_s30, %s1119_s0 }
  0x19   : > { %p715_p5 = pnand %p714_p3, %p713_p2  ;;  %p719_p7 = scmp.lt.u32.totalorder %s717_s16, %s712_s7 }
  0x1a   : > { %p721_p13 = scmp.lt.u32.totalorder %s712_s7, %s920_s30 }
  0x1b   : > { %p716_p6 = pneg %p715_p5  ;;  %p720_p10 = por %p719_p7, %p718_p4 }
  0x1d   : > { %p722_p12 = por %p721_p13, %p720_p10 }
  0x1f   : > { %p723_p1 = pnand %p722_p12, %p716_p6 }
  0x21   : > { %726 = shalt.err (!%p723_p1)
}
  0x22   : > { %s727_s20 = scalar_lea.vmem %s922_s4, 1024  ;;  %s826_s25 = smov [#allocation2]  }
  0x23   : > { %p728_p2 = scmp.ne.s32.totalorder %s922_s4, %s727_s20  ;;  %s732_s26 = sshll.u32 %s826_s25, 4  ;;  %s733_s26 = int_to_ptr.vmem [resolvable:$false] %s732_s26 }
  0x24   : > { %s734_s27 = scalar_lea.vmem %s733_s26, 2048  ;;  %p735_p9 = scmp.lt.s32.totalorder %s922_s4, %s733_s26 }
  0x25   : > { %p730_p5 = pnand %p728_p2, %p714_p3  ;;  %p736_p4 = scmp.lt.s32.totalorder %s734_s27, %s727_s20 }
  0x27   : > { %p731_p11 = pneg %p730_p5  ;;  %p737_p7 = por %p736_p4, %p735_p9 }
  0x29   : > { %p738_p10 = pnand %p737_p7, %p731_p11 }
  0x2b   : > { %741 = shalt.err (!%p738_p10)
}
  0x2c   : > { %s827_s28 = smov 256   ;;  %s828_s29 = smov 16  }
  0x2d   : > { %605 = dma.hbm_to_vmem [thread:$0]  (!%p926_p0), %s920_s30, 1024, %s922_s4, %s931_s6, %s827_s28, %s827_s28, %s828_s29  }
  0x2e   : > { %p161_p12 = scmp.lt.s32.totalorder %s824_s14, 3  ;;  %p1128_p1 = scmp.ge.s32.totalorder %s824_s14, 1 }
  0x30   : > { %p162_p3 = pnand %p1128_p1, %p161_p12 }
  0x31   : > { %s963_s3 = sand.u32 (!%p162_p3), 1, %s808_s10  }
  0x32   : > { %165 = sbr.rel (%p162_p3) target bundleno = 672 (0x2a0), region = 28  ;;  %s575_s7 = sshll.u32 (!%p162_p3), %s963_s3, 6 }
  0x33   : > { %s168_s8 = scalar_lea.sflag (!%p162_p3), [#allocation3], %s963_s3  ;;  %s171_s15 = scalar_lea.vmem (!%p162_p3), [#allocation2], %s575_s7 }
  0x39   : > { %795 = dma.done.wait (%p898_p8), %s168_s8, 1024  }
  0x3a   : > { %797 = vsyncadd (%p898_p8), %s168_s8, 4294966272  ;;  %v973_v0 = vld [vmem:[%s171_s15] sm:$0xff]  ;;  %v975_v1 = vld [vmem:[%s171_s15 + $0x8] sm:$0xff]  ;;  %s829_s18 = smov 1   ;;  %v830_v48 = vmov 0   ;;  %s831_s25 = smov 2  }
  0x3b   : > { %v977_v2 = vld [vmem:[%s171_s15 + $0x20] sm:$0xff]  ;;  %v211_v3 = vadd.f32 %v975_v1, %v973_v0  ;;  %v981_v4 = vld [vmem:[%s171_s15 + $0x28] sm:$0xff]  ;;  %v983_v5 = vld [vmem:[%s171_s15 + $0x10] sm:$0xff]  ;;  %668 = vset.pattern.permute.xlu0 %v830_v48  ;;  %669 = vset.pattern.permute.xlu1 %v830_v48  ;;  %s196_s26 = scalar_lea.vmem [#allocation5], %s575_s7  ;;  %s597_s27 = sshll.u32 %s816_s12, 10 }
  0x3c   : > { %v985_v6 = vld [vmem:[%s171_s15 + $0x18] sm:$0xff]  ;;  %v333_v7 = vadd.f32 %v981_v4, %v977_v2  ;;  %v989_v8 = vld [vmem:[%s171_s15 + $0x30] sm:$0xff]  ;;  %v1024_v40 = vld [vmem:[%s1120_s1 + $0x8] sm:$0xff]  ;;  %s464_s28 = sshll.u32 %s196_s26, 4  ;;  %s1067_s8 = scalar_lea.hbm %s1121_s2, %s597_s27  ;;  %s1069_s28 = int_to_ptr.vmem [resolvable:$true] %s464_s28 }
  0x3d   : > { %v991_v9 = vld [vmem:[%s171_s15 + $0x38] sm:$0xff]  ;;  %212 = vadd.xlane.f32.xlu0 %v211_v3  ;;  %v214_v10 = vadd.f32 %v985_v6, %v983_v5  ;;  %v209_v41 = vld [vmem:[%s1120_s1] sm:$0xff]  ;;  %v585_v44 = vld [vmem:[%s1120_s1 + $0x10] sm:$0xff]  ;;  %s448_s12 = scalar_lea.sflag [#allocation4], %s963_s3  ;;  %s742_s15 = scalar_lea.vmem %s1069_s28, 1024 }
  0x3e   : > { %334 = vadd.xlane.f32.xlu1 %v333_v7  ;;  %v336_v11 = vadd.f32 %v991_v9, %v989_v8  ;;  %v586_v46 = vld [vmem:[%s1120_s1 + $0x18] sm:$0xff]  ;;  %p743_p8 = scmp.ne.s32.totalorder %s1069_s28, %s742_s15  ;;  %p1129_p9 = scmp.ne.s32.totalorder %s1125_s22, 0 }
  0x3f   : > { %s833_s21 = smov [#allocation5]  }
  0x40   : > { %p744_p11 = pnand %p743_p8, %p1129_p9  ;;  %s746_s30 = sshll.u32 %s833_s21, 4  ;;  %s747_s30 = int_to_ptr.vmem [resolvable:$false] %s746_s30 }
  0x41   : > { %215 = vadd.xlane.f32.xlu0 %v214_v10  ;;  %s748_s4 = scalar_lea.vmem %s747_s30, 2048  ;;  %p749_p6 = scmp.lt.s32.totalorder %s1069_s28, %s747_s30 }
  0x42   : > { %337 = vadd.xlane.f32.xlu1 %v336_v11  ;;  %p745_p0 = pneg %p744_p11  ;;  %p750_p13 = scmp.lt.s32.totalorder %s748_s4, %s742_s15 }
  0x44   : > { %p751_p2 = por %p750_p13, %p749_p6 }
  0x46   : > { %p752_p5 = pnand %p751_p2, %p745_p0 }
  0xca   : > { %v213_v12 = vpop.xlane.xlu0 %212 }
  0xcb   : > { %v997_v13 = vmul.f32 0.00390625, %v213_v12  ;;  %v335_v14 = vpop.xlane.xlu1 %334 }
  0xcc   : > { %v999_v15 = vmul.f32 0.00390625, %v335_v14 }
  0xcd   : > { %v219_v16 = vsub.f32 %v973_v0, %v997_v13  ;;  %v220_v17 = vsub.f32 %v975_v1, %v997_v13  ;;  %v241_v43 = vmul.f32 %v997_v13, %v209_v41 }
  0xce   : > { %v216_v18 = vpop.xlane.xlu0 %215  ;;  %v341_v19 = vsub.f32 %v977_v2, %v999_v15  ;;  %v342_v20 = vsub.f32 %v981_v4, %v999_v15  ;;  %v363_v45 = vmul.f32 %v585_v44, %v999_v15 }
  0xcf   : > { %v1009_v21 = vmul.f32 0.00390625, %v216_v18  ;;  %v338_v22 = vpop.xlane.xlu1 %337  ;;  %v223_v23 = vmul.f32 %v219_v16, %v219_v16  ;;  %v224_v24 = vmul.f32 %v220_v17, %v220_v17 }
  0xd0   : > { %v1011_v25 = vmul.f32 0.00390625, %v338_v22  ;;  %v345_v26 = vmul.f32 %v341_v19, %v341_v19  ;;  %v346_v27 = vmul.f32 %v342_v20, %v342_v20 }
  0xd1   : > { %v227_v28 = vadd.f32 %v224_v24, %v223_v23  ;;  %v221_v29 = vsub.f32 %v983_v5, %v1009_v21  ;;  %v222_v30 = vsub.f32 %v985_v6, %v1009_v21  ;;  %v242_v42 = vmul.f32 %v1009_v21, %v1024_v40 }
  0xd2   : > { %v343_v31 = vsub.f32 %v989_v8, %v1011_v25  ;;  %v344_v32 = vsub.f32 %v991_v9, %v1011_v25  ;;  %v349_v33 = vadd.f32 %v346_v27, %v345_v26  ;;  %v364_v47 = vmul.f32 %v586_v46, %v1011_v25 }
  0xd3   : > { %228 = vadd.xlane.f32.xlu0 %v227_v28  ;;  %v225_v34 = vmul.f32 %v221_v29, %v221_v29  ;;  %v226_v35 = vmul.f32 %v222_v30, %v222_v30 }
  0xd4   : > { %v347_v36 = vmul.f32 %v343_v31, %v343_v31  ;;  %v348_v37 = vmul.f32 %v344_v32, %v344_v32 }
  0xd5   : > { %v230_v38 = vadd.f32 %v226_v35, %v225_v34 }
  0xd6   : > { %v352_v39 = vadd.f32 %v348_v37, %v347_v36 }
  0xd7   : > { %350 = vadd.xlane.f32.xlu0 %v349_v33  ;;  %231 = vadd.xlane.f32.xlu1 %v230_v38 }
  0xdb   : > { %353 = vadd.xlane.f32.xlu1 %v352_v39 }
  0xec   : > { %247 = vrot.lane.b32.xlu1 %v242_v42, %s829_s18 }
  0xed   : > { %245 = vrot.lane.b32.xlu0 %v241_v43, %s829_s18 }
  0xf0   : > { %367 = vrot.lane.b32.xlu1 %v363_v45, %s829_s18 }
  0xf4   : > { %369 = vrot.lane.b32.xlu1 %v364_v47, %s829_s18 }
 0x160   : > { %v229_v49 = vpop.xlane.xlu0 %228 }
 0x161   : > { %v233_v50 = vmul.f32 0.00390625, %v229_v49 }
 0x163   : > { %v235_v51 = vadd.f32 1e-05, %v233_v50 }
 0x164   : > { %v232_v52 = vpop.xlane.xlu1 %231  ;;  %v351_v53 = vpop.xlane.xlu0 %350 }
 0x165   : > { %672 = vrsqrt.f32 %v235_v51  ;;  %v234_v54 = vmul.f32 0.00390625, %v232_v52  ;;  %v355_v55 = vmul.f32 0.00390625, %v351_v53 }
 0x167   : > { %v236_v56 = vadd.f32 1e-05, %v234_v54  ;;  %v357_v57 = vadd.f32 1e-05, %v355_v55 }
 0x168   : > { %v354_v58 = vpop.xlane.xlu1 %353  ;;  %v246_v22 = vpop.permute.xlu0 %245 }
 0x169   : > { %674 = vrsqrt.f32 %v236_v56  ;;  %v356_v59 = vmul.f32 0.00390625, %v354_v58 }
 0x16a   : > { %676 = vrsqrt.f32 %v357_v57 }
 0x16b   : > { %v358_v60 = vadd.f32 1e-05, %v356_v59 }
 0x16c   : > { %v248_v19 = vpop.permute.xlu1 %247 }
 0x16d   : > { %678 = vrsqrt.f32 %v358_v60  ;;  %v252_v26 = vadd.f32 %v248_v19, %v1024_v40 }
 0x16f   : > { %v673_v61 = vpop.eup %672 }
 0x170   : > { %v239_v62 = vmul.f32 %v673_v61, %v209_v41  ;;  %v368_v20 = vpop.permute.xlu1 %367 }
 0x171   : > { %v373_v27 = vadd.f32 %v585_v44, %v368_v20 }
 0x172   : > { %v253_v63 = vmul.f32 %v239_v62, %v997_v13  ;;  %v832_v13 = vmov 2  }
 0x173   : > { %v675_v3 = vpop.eup %674 }
 0x174   : > { %v677_v7 = vpop.eup %676  ;;  %257 = vrot.lane.b32.xlu0 %v253_v63, %s831_s25  ;;  %v240_v10 = vmul.f32 %v675_v3, %v1024_v40  ;;  %v370_v23 = vpop.permute.xlu1 %369 }
 0x175   : > { %v361_v11 = vmul.f32 %v677_v7, %v585_v44  ;;  %v374_v31 = vadd.f32 %v586_v46, %v370_v23 }
 0x176   : > { %v254_v12 = vmul.f32 %v240_v10, %v1009_v21  ;;  %v251_v21 = vadd.f32 %v246_v22, %v209_v41 }
 0x177   : > { %v679_v14 = vpop.eup %678  ;;  %v375_v16 = vmul.f32 %v361_v11, %v999_v15 }
 0x178   : > { %259 = vrot.lane.b32.xlu1 %v254_v12, %s831_s25  ;;  %v362_v17 = vmul.f32 %v679_v14, %v586_v46 }
 0x179   : > { %379 = vrot.lane.b32.xlu0 %v375_v16, %s831_s25 }
 0x17a   : > { %v376_v18 = vmul.f32 %v362_v17, %v1011_v25 }
 0x17c   : > { %381 = vrot.lane.b32.xlu1 %v376_v18, %s831_s25 }
 0x17d   : > { %267 = vperm.xlu0 %668, %v239_v62  }
 0x180   : > { %272 = vperm.xlu1 %669, %v240_v10  }
 0x181   : > { %394 = vperm.xlu0 %668, %v362_v17  }
 0x184   : > { %389 = vperm.xlu1 %669, %v361_v11  }
 0x185   : > { %671 = vset.pattern.permute.xlu0 %v832_v13 }
 0x188   : > { %670 = vset.pattern.permute.xlu1 %v832_v13 }
 0x1e6   : > { %v258_v24 = vpop.permute.xlu0 %257 }
 0x1e7   : > { %v263_v15 = vsub.f32 %v251_v21, %v258_v24 }
 0x1e9   : > { %281 = vperm.xlu1 %670, %v263_v15  }
 0x1ea   : > { %v260_v25 = vpop.permute.xlu1 %259 }
 0x1eb   : > { %v264_v28 = vsub.f32 %v252_v26, %v260_v25  ;;  %v380_v29 = vpop.permute.xlu0 %379 }
 0x1ec   : > { %v385_v30 = vsub.f32 %v373_v27, %v380_v29 }
 0x1ed   : > { %286 = vperm.xlu0 %671, %v264_v28  }
 0x1ee   : > { %403 = vperm.xlu1 %670, %v385_v30   ;;  %v382_v32 = vpop.permute.xlu1 %381 }
 0x1ef   : > { %v386_v33 = vsub.f32 %v374_v31, %v382_v32 }
 0x1f2   : > { %408 = vperm.xlu1 %670, %v386_v33  }
 0x1fc   : > { %v268_v35 = vpop.permute.xlu0 %267 }
 0x1fd   : > { %v275_v37 = vmul.f32 %v268_v35, %v973_v0  ;;  %v276_v38 = vmul.f32 %v268_v35, %v975_v1 }
 0x1ff   : > { %v273_v34 = vpop.permute.xlu1 %272 }
 0x200   : > { %v395_v39 = vpop.permute.xlu0 %394  ;;  %v277_v43 = vmul.f32 %v273_v34, %v983_v5  ;;  %v278_v44 = vmul.f32 %v273_v34, %v985_v6 }
 0x201   : > { %v399_v55 = vmul.f32 %v989_v8, %v395_v39  ;;  %v400_v57 = vmul.f32 %v991_v9, %v395_v39 }
 0x203   : > { %v390_v36 = vpop.permute.xlu1 %389 }
 0x204   : > { %v397_v47 = vmul.f32 %v977_v2, %v390_v36  ;;  %v398_v48 = vmul.f32 %v981_v4, %v390_v36 }
 0x268   : > { %v282_v40 = vpop.permute.xlu1 %281 }
 0x269   : > { %v289_v41 = vadd.f32 %v282_v40, %v275_v37  ;;  %v290_v42 = vadd.f32 %v282_v40, %v276_v38 }
 0x26b   : > { %v577_v45 = vmul.f32 -1.442695, %v289_v41  ;;  %v578_v46 = vmul.f32 -1.442695, %v290_v42 }
 0x26c   : > { %v287_v49 = vpop.permute.xlu0 %286 }
 0x26d   : > { %680 = vpow2.f32 %v577_v45  ;;  %v404_v50 = vpop.permute.xlu1 %403  ;;  %v291_v51 = vadd.f32 %v287_v49, %v277_v43  ;;  %v292_v52 = vadd.f32 %v287_v49, %v278_v44 }
 0x26e   : > { %682 = vpow2.f32 %v578_v46  ;;  %v411_v53 = vadd.f32 %v404_v50, %v397_v47  ;;  %v412_v54 = vadd.f32 %v404_v50, %v398_v48 }
 0x26f   : > { %v579_v56 = vmul.f32 -1.442695, %v291_v51  ;;  %v580_v60 = vmul.f32 -1.442695, %v292_v52 }
 0x270   : > { %v587_v58 = vmul.f32 -1.442695, %v411_v53  ;;  %v588_v59 = vmul.f32 -1.442695, %v412_v54 }
 0x271   : > { %684 = vpow2.f32 %v579_v56  ;;  %v409_v61 = vpop.permute.xlu1 %408 }
 0x272   : > { %686 = vpow2.f32 %v587_v58  ;;  %v413_v62 = vadd.f32 %v409_v61, %v399_v55  ;;  %v414_v63 = vadd.f32 %v409_v61, %v400_v57 }
 0x273   : > { %688 = vpow2.f32 %v588_v59 }
 0x274   : > { %690 = vpow2.f32 %v580_v60  ;;  %v589_v3 = vmul.f32 -1.442695, %v413_v62  ;;  %v590_v7 = vmul.f32 -1.442695, %v414_v63 }
 0x276   : > { %692 = vpow2.f32 %v589_v3 }
 0x277   : > { %v681_v10 = vpop.eup %680  ;;  %694 = vpow2.f32 %v590_v7 }
 0x278   : > { %v683_v11 = vpop.eup %682  ;;  %v305_v12 = vadd.f32 1.0, %v681_v10 }
 0x279   : > { %v306_v14 = vadd.f32 1.0, %v683_v11 }
 0x27a   : > { %696 = vrcp.f32 %v305_v12 }
 0x27b   : > { %v685_v16 = vpop.eup %684  ;;  %698 = vrcp.f32 %v306_v14 }
 0x27c   : > { %v687_v17 = vpop.eup %686  ;;  %v307_v18 = vadd.f32 1.0, %v685_v16 }
 0x27d   : > { %v689_v13 = vpop.eup %688  ;;  %v427_v19 = vadd.f32 1.0, %v687_v17 }
 0x27e   : > { %v691_v20 = vpop.eup %690  ;;  %v428_v22 = vadd.f32 1.0, %v689_v13  ;;  %700 = vrcp.f32 %v307_v18 }
 0x27f   : > { %702 = vrcp.f32 %v427_v19  ;;  %v308_v21 = vadd.f32 1.0, %v691_v20 }
 0x280   : > { %v693_v23 = vpop.eup %692  ;;  %704 = vrcp.f32 %v428_v22 }
 0x281   : > { %v695_v24 = vpop.eup %694  ;;  %706 = vrcp.f32 %v308_v21  ;;  %v429_v15 = vadd.f32 1.0, %v693_v23 }
 0x282   : > { %v430_v26 = vadd.f32 1.0, %v695_v24 }
 0x283   : > { %708 = vrcp.f32 %v429_v15 }
 0x284   : > { %v697_v27 = vpop.eup %696  ;;  %710 = vrcp.f32 %v430_v26 }
 0x285   : > { %v699_v25 = vpop.eup %698  ;;  %v317_v28 = vmul.f32 %v697_v27, %v973_v0 }
 0x286   : > { %v318_v29 = vmul.f32 %v699_v25, %v975_v1 }
 0x287   : > { %321 = vst [vmem:[%s196_s26] sm:$0xff] %v317_v28 }
 0x288   : > { %v701_v30 = vpop.eup %700  ;;  %322 = vst [vmem:[%s196_s26 + $0x8] sm:$0xff] %v318_v29 }
 0x289   : > { %v703_v31 = vpop.eup %702  ;;  %v319_v32 = vmul.f32 %v701_v30, %v983_v5 }
 0x28a   : > { %v705_v33 = vpop.eup %704  ;;  %v439_v34 = vmul.f32 %v703_v31, %v977_v2 }
 0x28b   : > { %v707_v35 = vpop.eup %706  ;;  %v440_v36 = vmul.f32 %v705_v33, %v981_v4  ;;  %323 = vst [vmem:[%s196_s26 + $0x20] sm:$0xff] %v319_v32 }
 0x28c   : > { %443 = vst [vmem:[%s196_s26 + $0x10] sm:$0xff] %v439_v34  ;;  %v320_v0 = vmul.f32 %v707_v35, %v985_v6 }
 0x28d   : > { %v709_v1 = vpop.eup %708  ;;  %444 = vst [vmem:[%s196_s26 + $0x18] sm:$0xff] %v440_v36 }
 0x28e   : > { %v711_v37 = vpop.eup %710  ;;  %324 = vst [vmem:[%s196_s26 + $0x28] sm:$0xff] %v320_v0  ;;  %v441_v5 = vmul.f32 %v709_v1, %v989_v8 }
 0x28f   : > { %v442_v2 = vmul.f32 %v711_v37, %v991_v9 }
 0x290   : > { %445 = vst [vmem:[%s196_s26 + $0x30] sm:$0xff] %v441_v5 }
 0x291   : > { %446 = vst [vmem:[%s196_s26 + $0x38] sm:$0xff] %v442_v2 }
 0x292   : > { %755 = shalt.err (!%p752_p5)
}
 0x293   : > { %s756_s5 = scalar_lea.hbm %s1067_s8, 1024  ;;  %s760_s18 = scalar_lea.hbm %s1121_s2, 2048 }
 0x294   : > { %p757_p4 = scmp.ne.s32.totalorder %s1067_s8, %s756_s5  ;;  %p761_p12 = scmp.lt.u32.totalorder %s1067_s8, %s1121_s2 }
 0x295   : > { %p762_p1 = scmp.lt.u32.totalorder %s760_s18, %s756_s5  ;;  %p764_p8 = scmp.lt.u32.totalorder %s756_s5, %s1067_s8 }
 0x296   : > { %p758_p7 = pnand %p757_p4, %p1129_p9 }
 0x297   : > { %p763_p3 = por %p762_p1, %p761_p12 }
 0x298   : > { %p759_p10 = pneg %p758_p7 }
 0x299   : > { %p765_p11 = por %p764_p8, %p763_p3 }
 0x29b   : > { %p766_p0 = pnand %p765_p11, %p759_p10 }
 0x29d   : > { %769 = shalt.err (!%p766_p0)
}
 0x29e   : > { %s834_s25 = smov 512   ;;  %s835_s26 = smov 32  }
 0x29f   : > { %600 = dma.vmem_to_hbm [thread:$0]  (%p1129_p9), %s1069_s28, 1024, %s1067_s8, %s448_s12, %s834_s25, %s834_s25, %s835_s26  }
 0x2a0 PF: > { %s479_s27 = sand.u32 1, %s804_s9   ;;  %p1130_p6 = scmp.ne.s32.totalorder %s1126_s24, 0 }
 0x2a1   : > { %p1131_p13 = scmp.ge.s32.totalorder %s824_s14, 2  ;;  %s480_s29 = scalar_lea.sflag [#allocation4], %s479_s27 }
 0x2a3   : > { %p607_p2 = pnand %p1131_p13, %p1130_p6 }
 0x2a5   : > { %799 = dma.done.wait (!%p607_p2), %s480_s29, 1024  }
 0x2a6   : > { %801 = vsyncadd (!%p607_p2), %s480_s29, 4294966272  ;;  %s18_s14 = sadd.s32 1, %s824_s14   ;;  %s1132_s9 = smov %s808_s10 }
 0x2a7   : > { %p15_p5 = scmp.ge.s32.totalorder %s18_s14, 4   ;;  %s1133_s10 = smov %s812_s11 }
 0x2a8   : > { %s1134_s11 = smov %s907_s23  ;;  %s1135_s12 = smov %s820_s13 }
 0x2a9   : > { %s1136_s13 = smov %s1138_s17  ;;  %17 = sbr.rel (!%p15_p5) target bundleno = 6 (0x6), region = 78 }
 0x2b0   :  { %485 = vsyncpa [#allocation3], 1 }
 0x2b1   :  { %487 = vsyncpa [#allocation3 + $0x1], 1 }
 0x2b2   :  { %488 = vsyncpa [#allocation4], 1 }
 0x2b3   :  { %490 = vsyncpa [#allocation4 + $0x1], 1 }

</bundles_post_ra>
